<compile_context>
chip_gen: v5e
topology: v5e:2x2
jax: 0.10.0
libtpu: 0.0.40
codegen_flags: <defaults>
</compile_context>

<pallas_src>
import functools

import jax
import jax.numpy as jnp
import numpy as np
from jax.experimental import pallas as pl
from jax.experimental.pallas import tpu as pltpu


# ----------------------------- Pallas kernel --------------------------------

def _feature_kernel(frames_ref, w_ref, out_ref, *, n_bins_pad):
    """frames: [TM, F] bf16, w: [F, 2*Kp] bf16 (cos|sin, Hann folded in).

    out: [TM, Kp] = log(re^2 + im^2 + eps), cast to out_ref dtype.
    """
    y = jnp.dot(frames_ref[...], w_ref[...],
                preferred_element_type=jnp.float32)           # [TM, 2*Kp] f32
    re = y[:, :n_bins_pad]                                    # 128-lane aligned
    im = y[:, n_bins_pad:]
    out_ref[...] = jnp.log(re * re + im * im + 1e-8).astype(out_ref.dtype)


def _round_up(x, m):
    return ((x + m - 1) // m) * m


def _choose_tile(n_rows, tile_rows, min_splits=8):
    """Row tile: multiple of 16 (bf16 sublane), bounded by tile_rows, and small
    enough that large problems split into >= min_splits grid steps (keeps both
    v7x TensorCores busy; harmless on single-TC v5e/v6e)."""
    tm = _round_up(max(pl.cdiv(n_rows, min_splits), 1), 16)
    return max(16, min(tile_rows, tm))


def _feature_pallas(frames2d_bf16, w_fused_bf16, n_bins_pad, *,
                    tile_rows=2048, out_dtype=jnp.float32):
    """frames2d: [R, F] bf16, w_fused: [F, 2*Kp] bf16 -> [R, Kp] out_dtype."""
    R, F = frames2d_bf16.shape
    Kp = n_bins_pad
    assert w_fused_bf16.shape == (F, 2 * Kp)

    TM = _choose_tile(R, tile_rows)
    grid = (pl.cdiv(R, TM),)          # boundary block masked by Pallas, no pad

    out_bytes = jnp.dtype(out_dtype).itemsize
    # Double-buffered frames + out tiles, (conservatively) double weights.
    vmem_bytes = 2 * (TM * F * 2) + 2 * (TM * Kp * out_bytes) + 2 * (F * 2 * Kp * 2)
    vmem_bytes = int(min(max(vmem_bytes + (2 << 20), 8 << 20), 64 << 20))

    out = pl.pallas_call(
        functools.partial(_feature_kernel, n_bins_pad=Kp),
        out_shape=jax.ShapeDtypeStruct((R, Kp), out_dtype),
        grid_spec=pltpu.PrefetchScalarGridSpec(
            num_scalar_prefetch=0,
            grid=grid,
            in_specs=[
                pl.BlockSpec((TM, F), lambda i: (i, 0)),        # frames tile
                pl.BlockSpec((F, 2 * Kp), lambda i: (0, 0)),    # weights, VMEM-resident
            ],
            out_specs=pl.BlockSpec((TM, Kp), lambda i: (i, 0)),
        ),
        compiler_params=pltpu.CompilerParams(
            dimension_semantics=("parallel",),                  # megacore on v7x
            vmem_limit_bytes=vmem_bytes),
        cost_estimate=pl.CostEstimate(
            flops=int(2 * R * F * (2 * Kp)),
            transcendentals=int(R * Kp),
            bytes_accessed=int(R * F * 2 + F * 2 * Kp * 2 + R * Kp * out_bytes)),
    )(frames2d_bf16, w_fused_bf16)
    return out


# ------------------------------ glue / module -------------------------------

class FeaturesCalculator:
    """JAX/Pallas port of the torch FeaturesCalculator module."""

    def __init__(self, frame_len: int = 64, hop: int = 32, n_bins: int = 128,
                 tile_rows: int = 2048, feature_dtype=jnp.float32):
        if frame_len % hop != 0:
            raise ValueError("hop must divide frame_len for hop-aligned framing")
        self.frame_len = frame_len
        self.hop = hop
        self.n_bins = n_bins
        self.tile_rows = tile_rows
        self.feature_dtype = feature_dtype  # bf16 halves output HBM traffic (needs numerics sign-off)

        # Pad each half (re / im) of the basis to a 128-lane multiple so the
        # kernel's static re/im split stays on vreg boundaries for any n_bins.
        self.n_bins_pad = _round_up(n_bins, 128)

        # Deterministic analysis basis (cos / -sin "DFT-like" filterbank) with
        # the Hann window folded in: (f * win) @ W == f @ (diag(win) @ W).
        t = np.arange(frame_len, dtype=np.float64)[:, None]            # [F, 1]
        k = np.arange(n_bins, dtype=np.float64)[None, :] + 1.0         # [1, K]
        phase = 2.0 * np.pi * t * k / float(frame_len)
        scale = 1.0 / np.sqrt(frame_len)
        win = 0.5 - 0.5 * np.cos(2.0 * np.pi * np.arange(frame_len) / frame_len)
        w_re = np.zeros((frame_len, self.n_bins_pad), dtype=np.float64)
        w_im = np.zeros((frame_len, self.n_bins_pad), dtype=np.float64)
        w_re[:, :n_bins] = np.cos(phase) * scale * win[:, None]
        w_im[:, :n_bins] = -np.sin(phase) * scale * win[:, None]
        w_fused = np.concatenate([w_re, w_im], axis=1)                 # [F, 2*Kp]
        self.w_fused = jnp.asarray(w_fused, dtype=jnp.bfloat16)

    def __call__(self, signal: jnp.ndarray) -> jnp.ndarray:
        """signal: [B, C, T] float -> featvec: [B, N, C*n_bins]."""
        B, C, T = signal.shape
        F, H, K, Kp = self.frame_len, self.hop, self.n_bins, self.n_bins_pad
        N = (T - F) // H + 1
        nseg = F // H

        # Hop-aligned framing (no XLA gather), directly in [B, N, C, F] order so
        # the post-kernel reshape is a free contiguous view (no f32 transpose).
        sig = signal.astype(jnp.bfloat16)
        T_pad = _round_up(T, H)
        if T_pad != T:
            sig = jnp.pad(sig, ((0, 0), (0, 0), (0, T_pad - T)))
        nb = T_pad // H
        blocks = sig.reshape(B, C, nb, H).transpose(0, 2, 1, 3)        # [B, nb, C, H]
        frames = jnp.concatenate([blocks[:, s:s + N] for s in range(nseg)],
                                 axis=-1)                              # [B, N, C, F]
        frames2d = frames.reshape(B * N * C, F)

        # Hot path: Pallas kernel (fused bf16 MXU dot + power + log on TPU).
        feats = _feature_pallas(frames2d, self.w_fused, Kp,
                                tile_rows=self.tile_rows,
                                out_dtype=self.feature_dtype)          # [B*N*C, Kp]
        if Kp != K:
            feats = feats[:, :K]          # only for non-128-aligned n_bins
        # rows are already (b, n, c)-ordered -> free reshape, no transpose.
        return feats.reshape(B, N, C * K)


# --------------------------------- main --------------------------------------

if __name__ == "__main__":
    key = jax.random.PRNGKey(0)
    B, C, T = 2, 2, 256  # batch of 2 binaural (2-channel) signals, 256 samples
    signal = jax.random.normal(key, (B, C, T), dtype=jnp.float32)

    calc = FeaturesCalculator(frame_len=64, hop=32, n_bins=128)
    featvec = calc(signal)
    featvec = jax.block_until_ready(featvec)

    expected_frames = (T - 64) // 32 + 1
    assert featvec.shape == (B, expected_frames, C * 128), featvec.shape
    assert bool(jnp.all(jnp.isfinite(featvec)))
    print("KERNEL_OK")
</pallas_src>

<mosaic_0001>
module attributes {stable_mosaic.version = 11 : i64} {
  func.func @_feature_kernel(%arg0: i32, %arg1: memref<16x64xbf16, #tpu.memory_space<vmem>>, %arg2: memref<64x256xbf16, #tpu.memory_space<vmem>>, %arg3: memref<16x128xf32, #tpu.memory_space<vmem>>) attributes {dimension_semantics = [#tpu.dimension_semantics<parallel>], iteration_bounds = array<i64: 2>, scalar_prefetch = 0 : i64, scratch_operands = 0 : i64, tpu.core_type = #tpu.core_type<tc>, window_params = [{transform_indices = @transform_0, window_bounds = array<i64: 16, 64>}, {pipeline_mode = #tpu.pipeline_mode<synchronous>, transform_indices = @transform_1, window_bounds = array<i64: 64, 256>}, {transform_indices = @transform_2, window_bounds = array<i64: 16, 128>}]} {
    %c0 = arith.constant 0 : index
    %c0_0 = arith.constant 0 : index
    %0 = vector.load %arg1[%c0, %c0_0] : memref<16x64xbf16, #tpu.memory_space<vmem>>, vector<16x64xbf16>
    %c0_1 = arith.constant 0 : index
    %c0_2 = arith.constant 0 : index
    %1 = vector.load %arg2[%c0_1, %c0_2] : memref<64x256xbf16, #tpu.memory_space<vmem>>, vector<64x256xbf16>
    %cst = arith.constant dense<0.000000e+00> : vector<16x256xf32>
    %2 = tpu.matmul %0, %1, %cst {dimension_numbers = #tpu.dot_dimension_numbers<[1], [0], [0], [1], [0, 0, 1, 1], [], []>} : vector<16x64xbf16>, vector<64x256xbf16>, vector<16x256xf32> -> vector<16x256xf32>
    %3 = vector.extract_strided_slice %2 {offsets = [0, 0], sizes = [16, 128], strides = [1, 1]} : vector<16x256xf32> to vector<16x128xf32>
    %4 = vector.extract_strided_slice %2 {offsets = [0, 128], sizes = [16, 128], strides = [1, 1]} : vector<16x256xf32> to vector<16x128xf32>
    %5 = arith.mulf %3, %3 : vector<16x128xf32>
    %6 = arith.mulf %4, %4 : vector<16x128xf32>
    %7 = arith.addf %5, %6 : vector<16x128xf32>
    %cst_3 = arith.constant 9.99999993E-9 : f32
    %8 = vector.broadcast %cst_3 : f32 to vector<16x128xf32>
    %9 = arith.addf %7, %8 : vector<16x128xf32>
    %10 = math.log %9 : vector<16x128xf32>
    %c0_4 = arith.constant 0 : index
    %c0_5 = arith.constant 0 : index
    %11 = vector.load %arg3[%c0_4, %c0_5] : memref<16x128xf32, #tpu.memory_space<vmem>>, vector<16x128xf32>
    tpu.vector_store %arg3[%c0_4, %c0_5], %10 {strides = array<i32>} : memref<16x128xf32, #tpu.memory_space<vmem>>, vector<16x128xf32>,
    return
  }
  func.func @transform_0(%arg0: i32) -> (i32, i32) {
    %c0_i32 = arith.constant 0 : i32
    %c0_i32_0 = arith.constant 0 : i32
    return %arg0, %c0_i32 : i32, i32
  }
  func.func @transform_1(%arg0: i32) -> (i32, i32) {
    %c0_i32 = arith.constant 0 : i32
    %c0_i32_0 = arith.constant 0 : i32
    %c0_i32_1 = arith.constant 0 : i32
    return %c0_i32, %c0_i32_0 : i32, i32
  }
  func.func @transform_2(%arg0: i32) -> (i32, i32) {
    %c0_i32 = arith.constant 0 : i32
    %c0_i32_0 = arith.constant 0 : i32
    return %arg0, %c0_i32 : i32, i32
  }
}

</mosaic_0001>

<bundles_post_ra>
// kernel: tpu_custom_call.1
= control target key start
LH: loop header
LB: loop body
LE: loop exit
PB: predicated region body
PF: predicated region fallthrough
CT: control target
= control target key end

     0   :  { %7 = vsyncpa [#allocation3], 0  ;;  %s814_s0 = inlined_call_operand.hbm [shape: bf16[28,64], index: 0, kind: input, shape index: {}]   ;;  %s815_s1 = inlined_call_operand.hbm [shape: bf16[64,256], index: 1, kind: input, shape index: {}]   ;;  %s816_s2 = inlined_call_operand.hbm [shape: f32[28,128], index: 2, kind: output, shape index: {}]  }
   0x1   :  { %9 = vsyncpa [#allocation3 + $0x1], 0 }
   0x2   :  { %10 = vsyncpa [#allocation6], 0 }
   0x3   :  { %11 = vsyncpa [#allocation4], 0 }
   0x4   :  { %13 = vsyncpa [#allocation4 + $0x1], 0  ;;  %s670_s9 = smov 0   ;;  %s672_s10 = smov 0  }
   0x5   :  { %s674_s11 = smov 0   ;;  %s676_s12 = smov 0  }
   0x6 LB: > { %s691_s13 = sadd.s32 4294967295, %s646_s12   ;;  %s384_s14 = sadd.s32 4294967294, %s646_s12   ;;  %s646_s12 = sphi %s676_s12, %s826_s12   ;;  %s642_s11 = sphi %s674_s11, %s825_s11   ;;  %s638_s10 = sphi %s672_s10, %s824_s10   ;;  %s634_s9 = sphi %s670_s9, %s823_s9  }
   0x7   : > { %p39_p0 = scmp.ne.s32.totalorder %s638_s10, %s634_s9  ;;  %p40_p1 = scmp.eq.s32.totalorder %s691_s13, 0 }
   0x8   : > { %p84_p2 = scmp.eq.s32.totalorder %s691_s13, 1  ;;  %p90_p3 = scmp.eq.s32.totalorder %s384_s14, 1 }
   0x9   : > { %p700_p4 = por %p40_p1, %p39_p0  ;;  %p385_p5 = scmp.ge.s32.totalorder %s646_s12, 1 }
   0xa   : > { %p705_p6 = por %p90_p3, %p39_p0  ;;  %p97_p7 = scmp.lt.s32.totalorder %s646_s12, 3 }
   0xb   : > { %s108_s19 = sshll.u32 %s815_s1, 4  ;;  %s648_s21 = smov [#allocation5]   ;;  %s109_s19 = int_to_ptr.hbm [resolvable:$true] %s108_s19 }
   0xc   : > { %p713_p8 = pnand %p385_p5, %p97_p7  ;;  %s110_s22 = sshll.u32 %s648_s21, 4  ;;  %s111_s22 = int_to_ptr.vmem [resolvable:$true] %s110_s22 }
   0xd   : > { %s723_s23 = sadd.s32 1, %s646_s12   ;;  %s649_s24 = smov 128  }
   0xe   : > { %p457_p9 = pneg %p713_p8  ;;  %s650_s25 = smov 8  }
   0xf   : > { %s23_s26 = ssub.s32 %s646_s12, %s723_s23  ;;  %s26_s27 = sadd.s32 1, %s642_s11 }
  0x10   : > { %p458_p10 = pnand %p457_p9, %p40_p1  ;;  %p24_p12 = scmp.eq.s32.totalorder %s23_s26, 0 }
  0x11   : > { %p33_p13 = scmp.ne.s32.totalorder %s642_s11, %s638_s10  ;;  %p34_p0 = scmp.eq.s32.totalorder %s646_s12, 0 }
  0x12   : > { %460 = dma.hbm_to_vmem [thread:$0]  (!%p458_p10), %s109_s19, 1024, %s111_s22, [#allocation6], %s649_s24, %s649_s24, %s650_s25  }
  0x13   : > { %p470_p3 = scmp.lt.s32.totalorder %s646_s12, 2  ;;  %p35_p5 = por %p34_p0, %p33_p13 }
  0x14   : > { %s733_s28 = scalar_select %p24_p12, %s642_s11, %s26_s27  }
  0x15   : > { %p737_p7 = por %p84_p2, %p33_p13  ;;  %s124_s30 = sand.u32 1, %s642_s11  }
  0x16   : > { %s438_s3 = sshll.u32 %s646_s12, 3  ;;  %s388_s4 = sshll.u32 %s124_s30, 3 }
  0x17   : > { %s133_s7 = scalar_lea.hbm %s814_s0, %s438_s3  ;;  %s128_s14 = scalar_lea.vmem [#allocation2], %s388_s4 }
  0x18   : > { %s134_s8 = sshll.u32 %s133_s7, 4  ;;  %s136_s17 = sshll.u32 %s128_s14, 4  ;;  %s135_s8 = int_to_ptr.hbm [resolvable:$true] %s134_s8  ;;  %s137_s17 = int_to_ptr.vmem [resolvable:$true] %s136_s17 }
  0x19   : > { %p748_p9 = pnand %p470_p3, %p35_p5  ;;  %s125_s19 = scalar_lea.sflag [#allocation3], %s124_s30 }
  0x1a   : > { %s546_s21 = sshra.s32 %s135_s8, 4  ;;  %s553_s26 = scalar_lea.hbm %s814_s0, 16  ;;  %s547_s21 = int_to_ptr.hbm [resolvable:$true] %s546_s21 }
  0x1b   : > { %s548_s22 = scalar_lea.hbm %s547_s21, 8  ;;  %p550_p10 = pneg %p748_p9 }
  0x1c   : > { %p549_p2 = scmp.ne.s32.totalorder %s547_s21, %s548_s22  ;;  %p554_p0 = scmp.lt.s32.totalorder %s547_s21, %s814_s0 }
  0x1d   : > { %p555_p3 = scmp.lt.s32.totalorder %s553_s26, %s548_s22 }
  0x1e   : > { %p551_p12 = pnand %p550_p10, %p549_p2 }
  0x1f   : > { %p556_p5 = por %p555_p3, %p554_p0 }
  0x20   : > { %p552_p13 = pneg %p551_p12 }
  0x22   : > { %p557_p11 = pnand %p556_p5, %p552_p13 }
  0x24   : > { %560 = shalt.err (!%p557_p11)
}
  0x25   : > { %s651_s30 = smov 64   ;;  %s652_s4 = smov 4  }
  0x26   : > { %464 = dma.hbm_to_vmem [thread:$0]  (!%p748_p9), %s135_s8, 128, %s137_s17, %s125_s19, %s651_s30, %s651_s30, %s652_s4  }
  0x27   : > { %148 = sbr.rel (%p713_p8) target bundleno = 219 (0xdb), region = 28  ;;  %s765_s5 = sand.u32 (!%p713_p8), 1, %s638_s10  }
  0x28   : > { %s392_s6 = sshll.u32 (!%p713_p8), %s765_s5, 3  ;;  %s151_s7 = scalar_lea.sflag (!%p713_p8), [#allocation3], %s765_s5 }
  0x29   : > { %s769_s14 = scalar_lea.vmem (!%p713_p8), [#allocation2], %s392_s6 }
  0x2c   : > { %621 = dma.done.wait (%p700_p4), %s151_s7, 128  }
  0x2d   : > { %623 = vsyncadd (%p700_p4), %s151_s7, 4294967168 }
  0x2e   : > { %625 = dma.done.wait (%p40_p1), [#allocation6], 1024  }
  0x2f   : > { %627 = vsyncadd (%p40_p1), [#allocation6], 4294966272  ;;  %v425_v0 = vld [vmem:[#allocation5 + $0x30] sm:$0xf]  ;;  %v447_v1 = vld [vmem:[#allocation5 + $0x34] sm:$0xf0] }
  0x30   : > { %v446_v2 = vld [vmem:[#allocation5 + $0x34] sm:$0xf]  ;;  %v426_v3 = vor.u32 %v447_v1, %v425_v0  ;;  %v427_v4 = vld [vmem:[#allocation5 + $0x38] sm:$0xf0]  ;;  %v417_v5 = vld [vmem:[#allocation5 + $0x20] sm:$0xf] }
  0x31   : > { %v445_v6 = vld [vmem:[#allocation5 + $0x24] sm:$0xf0]  ;;  %v430_v7 = vor.u32 %v446_v2, %v427_v4  ;;  %v444_v8 = vld [vmem:[#allocation5 + $0x24] sm:$0xf]  ;;  %v419_v9 = vld [vmem:[#allocation5 + $0x28] sm:$0xf0] }
  0x32   : > { %247 = vmatpush.bf16.msra.mxu0 %v426_v3  ;;  %v418_v10 = vor.u32 %v445_v6, %v417_v5  ;;  %v422_v11 = vor.u32 %v444_v8, %v419_v9  ;;  %v409_v12 = vld [vmem:[#allocation5 + $0x10] sm:$0xf]  ;;  %v443_v13 = vld [vmem:[#allocation5 + $0x14] sm:$0xf0]  ;;  %v442_v14 = vld [vmem:[#allocation5 + $0x14] sm:$0xf] }
  0x33   : > { %261 = vmatpush.bf16.msra.mxu1 %v430_v7  ;;  %v411_v15 = vld [vmem:[#allocation5 + $0x18] sm:$0xf0]  ;;  %v410_v16 = vor.u32 %v443_v13, %v409_v12  ;;  %v401_v18 = vld [vmem:[#allocation5] sm:$0xf]  ;;  %v441_v19 = vld [vmem:[#allocation5 + $0x4] sm:$0xf0] }
  0x34   : > { %v414_v17 = vor.u32 %v442_v14, %v411_v15  ;;  %v440_v20 = vld [vmem:[#allocation5 + $0x4] sm:$0xf]  ;;  %v403_v21 = vld [vmem:[#allocation5 + $0x8] sm:$0xf0]  ;;  %v402_v22 = vor.u32 %v441_v19, %v401_v18  ;;  %v439_v24 = vld [vmem:[%s769_s14] sm:$0xff]  ;;  %vm239_vm0 = vcmask 523264  }
  0x35   : > { %v406_v23 = vor.u32 %v440_v20, %v403_v21  ;;  %s394_s15 = sshll.u32 %s765_s5, 4  ;;  %s448_s20 = sshll.u32 %s691_s13, 4 }
  0x36   : > { %248 = vmatpush.bf16.msra.mxu0 %v418_v10  ;;  %s297_s18 = scalar_lea.hbm %s816_s2, %s448_s20  ;;  %s180_s19 = scalar_lea.vmem [#allocation7], %s394_s15 }
  0x37   : > { %262 = vmatpush.bf16.msra.mxu1 %v422_v11  ;;  %s298_s21 = sshll.u32 %s180_s19, 4  ;;  %s300_s22 = sshll.u32 %s297_s18, 4  ;;  %s299_s21 = int_to_ptr.vmem [resolvable:$true] %s298_s21  ;;  %s301_s22 = int_to_ptr.hbm [resolvable:$true] %s300_s22 }
  0x38   : > { %s286_s24 = scalar_lea.sflag [#allocation4], %s765_s5  ;;  %s590_s13 = sshra.s32 %s301_s22, 4  ;;  %s591_s13 = int_to_ptr.hbm [resolvable:$true] %s590_s13 }
  0x39   : > { %s592_s25 = scalar_lea.hbm %s591_s13, 16  ;;  %s596_s3 = scalar_lea.hbm %s816_s2, 32 }
  0x3a   : > { %249 = vmatpush.bf16.msra.mxu0 %v410_v16  ;;  %p593_p1 = scmp.ne.s32.totalorder %s591_s13, %s592_s25  ;;  %p597_p11 = scmp.lt.s32.totalorder %s591_s13, %s816_s2 }
  0x3b   : > { %263 = vmatpush.bf16.msra.mxu1 %v414_v17  ;;  %p598_p9 = scmp.lt.s32.totalorder %s596_s3, %s592_s25 }
  0x3c   : > { %p594_p4 = pnand %p593_p1, %p737_p7 }
  0x3d   : > { %p599_p2 = por %p598_p9, %p597_p11 }
  0x3e   : > { %250 = vmatpush.bf16.msra.mxu0 %v402_v22  ;;  %p595_p8 = pneg %p594_p4 }
  0x3f   : > { %264 = vmatpush.bf16.msra.mxu1 %v406_v23 }
  0x40   : > { %p600_p10 = pnand %p599_p2, %p595_p8 }
  0x41   : > { %431 = vmatmul.msk.bf16.vlgmr.msra.gmra.mxu0 %vm239_vm0, %v439_v24 }
  0x42   : > { %432 = vmatmul.msk.bf16.vlgmr.msra.gmra.mxu1 %vm239_vm0, %v439_v24 }
  0xbe   : > { %v252_v25 = vpop.f32.mrf.mxu0 }
  0xbf   : > { %v271_v26 = vmul.f32 %v252_v25, %v252_v25  ;;  %v266_v27 = vpop.f32.mrf.mxu1 }
  0xc0   : > { %v273_v28 = vmul.f32 %v266_v27, %v266_v27 }
  0xc2   : > { %v275_v29 = vadd.f32 %v273_v28, %v271_v26 }
  0xc4   : > { %v277_v30 = vadd.f32 1e-08, %v275_v29 }
  0xc6   : > { %512 = vlog2.f32 %v277_v30  ;;  %v254_v31 = vpop.f32.mrf.mxu0 }
  0xc7   : > { %v272_v32 = vmul.f32 %v254_v31, %v254_v31  ;;  %v268_v33 = vpop.f32.mrf.mxu1 }
  0xc8   : > { %v274_v34 = vmul.f32 %v268_v33, %v268_v33 }
  0xca   : > { %v276_v35 = vadd.f32 %v274_v34, %v272_v32 }
  0xcc   : > { %v513_v36 = vpop.eup %512  ;;  %v278_v37 = vadd.f32 1e-08, %v276_v35 }
  0xcd   : > { %v280_v38 = vmul.f32 0.6931472, %v513_v36 }
  0xce   : > { %514 = vlog2.f32 %v278_v37 }
  0xcf   : > { %283 = vst [vmem:[%s180_s19] sm:$0xff] %v280_v38 }
  0xd4   : > { %v515_v39 = vpop.eup %514 }
  0xd5   : > { %v282_v40 = vmul.f32 0.6931472, %v515_v39 }
  0xd7   : > { %284 = vst [vmem:[%s180_s19 + $0x8] sm:$0xff] %v282_v40 }
  0xd8   : > { %603 = shalt.err (!%p600_p10)
}
  0xd9   : > { %s653_s5 = smov 128   ;;  %s654_s6 = smov 8  }
  0xda   : > { %455 = dma.vmem_to_hbm [thread:$0]  (%p737_p7), %s299_s21, 256, %s301_s22, %s286_s24, %s653_s5, %s653_s5, %s654_s6  }
  0xdb PF: > { %s315_s7 = sand.u32 1, %s634_s9   ;;  %p822_p12 = scmp.ge.s32.totalorder %s646_s12, 2 }
  0xdc   : > { %s316_s14 = scalar_lea.sflag [#allocation4], %s315_s7 }
  0xdd   : > { %p466_p13 = pnand %p822_p12, %p705_p6 }
  0xdf   : > { %p467_p0 = pneg %p466_p13 }
  0xe1   : > { %629 = dma.done.wait (%p467_p0), %s316_s14, 256  }
  0xe2   : > { %631 = vsyncadd (%p467_p0), %s316_s14, 4294967040  ;;  %p16_p3 = scmp.ge.s32.totalorder %s723_s23, 4   ;;  %s823_s9 = smov %s638_s10 }
  0xe3   : > { %s824_s10 = smov %s642_s11  ;;  %s825_s11 = smov %s733_s28 }
  0xe4   : > { %s826_s12 = smov %s723_s23  ;;  %18 = sbr.rel (!%p16_p3) target bundleno = 6 (0x6), region = 77 }
  0xe9   :  { %322 = vsyncpa [#allocation3], 1 }
  0xea   :  { %324 = vsyncpa [#allocation3 + $0x1], 1 }
  0xeb   :  { %325 = vsyncpa [#allocation6], 1 }
  0xec   :  { %326 = vsyncpa [#allocation4], 1 }
  0xed   :  { %328 = vsyncpa [#allocation4 + $0x1], 1 }

</bundles_post_ra>
